<compile_context>
chip_gen: v7x
topology: tpu7x:2x2x1
jax: 0.10.0
libtpu: 0.0.40
codegen_flags: <defaults>
</compile_context>

<pallas_src>
import functools

import jax
import jax.numpy as jnp
from jax import lax
from jax.experimental import pallas as pl
from jax.experimental.pallas import tpu as pltpu

_EPS = 1e-6
_NUM_PARTS = 2  # v7x has 2 TensorCores; harmless (runs sequentially) on v5e/v6e.


def _iou_loss_kernel(pred_ref, tgt_ref, out_ref, acc_ref, *, n_valid, block_n):
    part = pl.program_id(0)
    j = pl.program_id(1)
    nj = pl.num_programs(1)

    @pl.when(j == 0)
    def _():
        acc_ref[...] = jnp.zeros_like(acc_ref)

    x = pred_ref[...].astype(jnp.float32)        # (BN, C, L) logits
    t = tgt_ref[...]                             # (BN, 1, L) int32 labels
    bn, c, seq = x.shape

    # Numerically stable softmax pieces; the full softmax is never materialized.
    m = jnp.max(x, axis=1, keepdims=True)        # (BN, 1, L)
    e = jnp.exp(x - m)                           # (BN, C, L)
    s = jnp.sum(e, axis=1, keepdims=True)        # (BN, 1, L)

    # Probability of the target class at every position (one-hot select, then
    # normalize only the selected logit).
    cls = lax.broadcasted_iota(jnp.int32, (bn, c, seq), 1)
    onehot = (cls == t).astype(jnp.float32)                  # (BN, C, L)
    e_true = jnp.sum(e * onehot, axis=1, keepdims=True)      # (BN, 1, L)
    p_true = e_true / s                                      # (BN, 1, L)

    # intersection_n = sum_l softmax[n, target_l, l]
    # cardinality_n  = sum_l (sum_c softmax + 1) == 2*L analytically.
    inter = jnp.sum(p_true, axis=2)                          # (BN, 1)
    union = jnp.float32(2.0 * seq) - inter                   # (BN, 1)
    iou = (inter + _EPS) / (union + _EPS)
    per_sample = 1.0 - iou                                   # (BN, 1)

    # Mask padded tail samples (batch padded up to NUM_PARTS * blocks * BN).
    row0 = (part * nj + j) * block_n
    rows = row0 + lax.broadcasted_iota(jnp.int32, (bn, 1), 0)
    valid = (rows < n_valid).astype(jnp.float32)

    acc_ref[...] += jnp.sum(per_sample * valid, keepdims=True)   # (1, 1)

    @pl.when(j == nj - 1)
    def _():
        # Single lane-dense store of this part's partial sum.
        out_ref[...] = jnp.broadcast_to(
            acc_ref[...].reshape(1, 1, 1), out_ref.shape)


def _pick_block_n(n, c, seq, num_parts, block_budget_bytes=4 * 1024 * 1024):
    """Samples per block, sized from the VMEM footprint of one (pred+target) block."""
    c_pad = ((max(c, 1) + 7) // 8) * 8        # pred sublane padding
    bytes_per_sample = (c_pad + 8) * seq * 4  # padded f32 pred + padded int32 target
    bn = max(1, block_budget_bytes // bytes_per_sample)
    per_part = -(-n // num_parts)
    return int(max(1, min(bn, per_part)))


def iou_loss(pred, target, *, block_n=None):
    """Forward of the PyTorch IoULoss module."""
    n, c, seq = pred.shape
    tgt = target.reshape(n, 1, seq).astype(jnp.int32)

    if block_n is None:
        block_n = _pick_block_n(n, c, seq, _NUM_PARTS)

    blocks_total = -(-n // block_n)
    blocks_per_part = -(-blocks_total // _NUM_PARTS)
    n_pad = _NUM_PARTS * blocks_per_part * block_n

    if n_pad != n:
        pred = jnp.pad(pred, ((0, n_pad - n), (0, 0), (0, 0)))
        tgt = jnp.pad(tgt, ((0, n_pad - n), (0, 0), (0, 0)))

    kernel = functools.partial(_iou_loss_kernel, n_valid=n, block_n=block_n)
    bpp = blocks_per_part

    # TODO(synk): for very long L, add an inner "arbitrary" grid axis tiling L in
    # multiples of 128 and accumulate per-lane partials; here L is loaded whole.
    partials = pl.pallas_call(
        kernel,
        out_shape=jax.ShapeDtypeStruct((_NUM_PARTS, 1, 128), jnp.float32),
        grid_spec=pltpu.PrefetchScalarGridSpec(
            num_scalar_prefetch=0,
            grid=(_NUM_PARTS, blocks_per_part),
            in_specs=[
                pl.BlockSpec((block_n, c, seq),
                             lambda p, j, bpp=bpp: (p * bpp + j, 0, 0)),
                pl.BlockSpec((block_n, 1, seq),
                             lambda p, j, bpp=bpp: (p * bpp + j, 0, 0)),
            ],
            out_specs=pl.BlockSpec((1, 1, 128), lambda p, j: (p, 0, 0)),
            scratch_shapes=[pltpu.VMEM((1, 1), jnp.float32)],
        ),
        compiler_params=pltpu.CompilerParams(
            dimension_semantics=("parallel", "arbitrary"),
            vmem_limit_bytes=32 * 1024 * 1024,
        ),
    )(pred, tgt)

    return jnp.sum(partials[:, 0, 0]) / n


def _reference_iou_loss(pred, target):
    """Pure-JAX reference reproducing the PyTorch IoULoss semantics."""
    _, c, _ = pred.shape
    soft = jax.nn.softmax(pred.astype(jnp.float32), axis=1)      # (N, C, L)
    soft = jnp.swapaxes(soft, 1, 2)                              # (N, L, C)
    onehot = jax.nn.one_hot(target, c, dtype=jnp.float32)        # (N, L, C)
    intersection = jnp.sum(soft * onehot, axis=(1, 2))
    cardinality = jnp.sum(soft + onehot, axis=(1, 2))
    union = cardinality - intersection
    iou = (intersection + _EPS) / (union + _EPS)
    return jnp.mean(1.0 - iou)


if __name__ == "__main__":
    key = jax.random.PRNGKey(0)
    k1, k2 = jax.random.split(key)

    N, C, L = 4, 4, 128
    pred = jax.random.normal(k1, (N, C, L), dtype=jnp.float32)
    target = jax.random.randint(k2, (N, L), 0, C, dtype=jnp.int32)

    loss = jax.block_until_ready(iou_loss(pred, target))
    ref = jax.block_until_ready(_reference_iou_loss(pred, target))
    assert jnp.allclose(loss, ref, atol=1e-5, rtol=1e-5), (loss, ref)

    print("KERNEL_OK")
</pallas_src>

<mosaic_0001>
module attributes {stable_mosaic.version = 11 : i64} {
  func.func @_iou_loss_kernel(%arg0: i32, %arg1: i32, %arg2: memref<2x4x128xf32, #tpu.memory_space<vmem>>, %arg3: memref<2x1x128xi32, #tpu.memory_space<vmem>>, %arg4: memref<1x1x128xf32, #tpu.memory_space<vmem>>, %arg5: memref<1x1xf32, #tpu.memory_space<vmem>>) attributes {dimension_semantics = [#tpu.dimension_semantics<parallel>, #tpu.dimension_semantics<arbitrary>], iteration_bounds = array<i64: 2, 1>, scalar_prefetch = 0 : i64, scratch_operands = 1 : i64, tpu.core_type = #tpu.core_type<tc>, window_params = [{transform_indices = @transform_0, window_bounds = array<i64: 2, 4, 128>}, {transform_indices = @transform_1, window_bounds = array<i64: 2, 1, 128>}, {transform_indices = @transform_2, window_bounds = array<i64: 1, 1, 128>}]} {
    %c0_i32 = arith.constant 0 : i32
    %0 = arith.cmpi eq, %arg1, %c0_i32 : i32
    %1 = arith.extui %0 : i1 to i32
    %c0_i32_0 = arith.constant 0 : i32
    %2 = arith.cmpi ne, %1, %c0_i32_0 : i32
    scf.if %2 {
      %cst_20 = arith.constant 0.000000e+00 : f32
      %53 = vector.broadcast %cst_20 : f32 to vector<1x1xf32>
      %c0_21 = arith.constant 0 : index
      %c0_22 = arith.constant 0 : index
      %54 = vector.load %arg5[%c0_21, %c0_22] : memref<1x1xf32, #tpu.memory_space<vmem>>, vector<1x1xf32>
      tpu.vector_store %arg5[%c0_21, %c0_22], %53 {strides = array<i32>} : memref<1x1xf32, #tpu.memory_space<vmem>>, vector<1x1xf32>,
    } else {
    }
    %c0 = arith.constant 0 : index
    %c0_1 = arith.constant 0 : index
    %c0_2 = arith.constant 0 : index
    %3 = vector.load %arg2[%c0, %c0_1, %c0_2] : memref<2x4x128xf32, #tpu.memory_space<vmem>>, vector<2x4x128xf32>
    %c0_3 = arith.constant 0 : index
    %c0_4 = arith.constant 0 : index
    %c0_5 = arith.constant 0 : index
    %4 = vector.load %arg3[%c0_3, %c0_4, %c0_5] : memref<2x1x128xi32, #tpu.memory_space<vmem>>, vector<2x1x128xi32>
    %cst = arith.constant dense<0xFF800000> : vector<2x128xf32>
    %5 = vector.multi_reduction <maximumf>, %3, %cst [1] : vector<2x4x128xf32> to vector<2x128xf32>
    %6 = vector.shape_cast %5 : vector<2x128xf32> to vector<2x1x128xf32>
    %7 = vector.broadcast %6 : vector<2x1x128xf32> to vector<2x4x128xf32>
    %8 = arith.subf %3, %7 : vector<2x4x128xf32>
    %9 = math.exp %8 : vector<2x4x128xf32>
    %cst_6 = arith.constant dense<0.000000e+00> : vector<2x128xf32>
    %10 = vector.multi_reduction <add>, %9, %cst_6 [1] : vector<2x4x128xf32> to vector<2x128xf32>
    %11 = vector.shape_cast %10 : vector<2x128xf32> to vector<2x1x128xf32>
    %12 = tpu.iota {dimensions = array<i32: 1>} : vector<2x4x128xi32>
    %13 = vector.broadcast %4 : vector<2x1x128xi32> to vector<2x4x128xi32>
    %14 = arith.cmpi eq, %12, %13 : vector<2x4x128xi32>
    %15 = arith.extui %14 : vector<2x4x128xi1> to vector<2x4x128xi32>
    %16 = arith.sitofp %15 : vector<2x4x128xi32> to vector<2x4x128xf32>
    %17 = arith.mulf %9, %16 : vector<2x4x128xf32>
    %cst_7 = arith.constant dense<0.000000e+00> : vector<2x128xf32>
    %18 = vector.multi_reduction <add>, %17, %cst_7 [1] : vector<2x4x128xf32> to vector<2x128xf32>
    %19 = vector.shape_cast %18 : vector<2x128xf32> to vector<2x1x128xf32>
    %20 = arith.divf %19, %11 : vector<2x1x128xf32>
    %cst_8 = arith.constant dense<0.000000e+00> : vector<2x1xf32>
    %21 = vector.multi_reduction <add>, %20, %cst_8 [2] : vector<2x1x128xf32> to vector<2x1xf32>
    %cst_9 = arith.constant 2.560000e+02 : f32
    %22 = vector.broadcast %cst_9 : f32 to vector<2x1xf32>
    %23 = arith.subf %22, %21 : vector<2x1xf32>
    %cst_10 = arith.constant 9.99999997E-7 : f32
    %24 = vector.broadcast %cst_10 : f32 to vector<2x1xf32>
    %25 = arith.addf %21, %24 : vector<2x1xf32>
    %cst_11 = arith.constant 9.99999997E-7 : f32
    %26 = vector.broadcast %cst_11 : f32 to vector<2x1xf32>
    %27 = arith.addf %23, %26 : vector<2x1xf32>
    %28 = arith.divf %25, %27 : vector<2x1xf32>
    %cst_12 = arith.constant 1.000000e+00 : f32
    %29 = vector.broadcast %cst_12 : f32 to vector<2x1xf32>
    %30 = arith.subf %29, %28 : vector<2x1xf32>
    %c1_i32 = arith.constant 1 : i32
    %31 = arith.muli %arg0, %c1_i32 : i32
    %32 = arith.addi %31, %arg1 : i32
    %c2_i32 = arith.constant 2 : i32
    %33 = arith.muli %32, %c2_i32 : i32
    %34 = tpu.iota {dimensions = array<i32: 0>} : vector<2x1xi32>
    %35 = vector.broadcast %33 : i32 to vector<2x1xi32>
    %36 = arith.addi %35, %34 : vector<2x1xi32>
    %c4_i32 = arith.constant 4 : i32
    %37 = vector.broadcast %c4_i32 : i32 to vector<2x1xi32>
    %38 = arith.cmpi slt, %36, %37 : vector<2x1xi32>
    %39 = arith.extui %38 : vector<2x1xi1> to vector<2x1xi32>
    %40 = arith.sitofp %39 : vector<2x1xi32> to vector<2x1xf32>
    %c0_13 = arith.constant 0 : index
    %c0_14 = arith.constant 0 : index
    %41 = vector.load %arg5[%c0_13, %c0_14] : memref<1x1xf32, #tpu.memory_space<vmem>>, vector<1x1xf32>
    %42 = arith.mulf %30, %40 : vector<2x1xf32>
    %43 = vector.shape_cast %42 : vector<2x1xf32> to vector<1x2x1xf32>
    %cst_15 = arith.constant dense<0.000000e+00> : vector<1xf32>
    %44 = vector.multi_reduction <add>, %43, %cst_15 [1, 2] : vector<1x2x1xf32> to vector<1xf32>
    %45 = vector.shape_cast %44 : vector<1xf32> to vector<1x1x1xf32>
    %46 = vector.extract %45[0, 0, 0] : f32 from vector<1x1x1xf32>
    %47 = vector.broadcast %46 : f32 to vector<1x1xf32>
    %48 = arith.addf %41, %47 : vector<1x1xf32>
    %c0_16 = arith.constant 0 : index
    %c0_17 = arith.constant 0 : index
    %49 = vector.load %arg5[%c0_16, %c0_17] : memref<1x1xf32, #tpu.memory_space<vmem>>, vector<1x1xf32>
    tpu.vector_store %arg5[%c0_16, %c0_17], %48 {strides = array<i32>} : memref<1x1xf32, #tpu.memory_space<vmem>>, vector<1x1xf32>,
    %c0_i32_18 = arith.constant 0 : i32
    %50 = arith.cmpi eq, %arg1, %c0_i32_18 : i32
    %51 = arith.extui %50 : i1 to i32
    %c0_i32_19 = arith.constant 0 : i32
    %52 = arith.cmpi ne, %51, %c0_i32_19 : i32
    scf.if %52 {
      %c0_20 = arith.constant 0 : index
      %c0_21 = arith.constant 0 : index
      %53 = vector.load %arg5[%c0_20, %c0_21] : memref<1x1xf32, #tpu.memory_space<vmem>>, vector<1x1xf32>
      %54 = vector.shape_cast %53 : vector<1x1xf32> to vector<1x1x1xf32>
      %55 = vector.shape_cast %54 : vector<1x1x1xf32> to vector<1x1x1xf32>
      %56 = vector.broadcast %55 : vector<1x1x1xf32> to vector<1x1x128xf32>
      %c0_22 = arith.constant 0 : index
      %c0_23 = arith.constant 0 : index
      %c0_24 = arith.constant 0 : index
      %57 = vector.load %arg4[%c0_22, %c0_23, %c0_24] : memref<1x1x128xf32, #tpu.memory_space<vmem>>, vector<1x1x128xf32>
      tpu.vector_store %arg4[%c0_22, %c0_23, %c0_24], %56 {strides = array<i32>} : memref<1x1x128xf32, #tpu.memory_space<vmem>>, vector<1x1x128xf32>,
    } else {
    }
    return
  }
  func.func @transform_0(%arg0: i32, %arg1: i32) -> (i32, i32, i32) {
    %c1_i32 = arith.constant 1 : i32
    %0 = arith.muli %arg0, %c1_i32 : i32
    %1 = arith.addi %0, %arg1 : i32
    %c0_i32 = arith.constant 0 : i32
    %c0_i32_0 = arith.constant 0 : i32
    %c0_i32_1 = arith.constant 0 : i32
    return %1, %c0_i32, %c0_i32_0 : i32, i32, i32
  }
  func.func @transform_1(%arg0: i32, %arg1: i32) -> (i32, i32, i32) {
    %c1_i32 = arith.constant 1 : i32
    %0 = arith.muli %arg0, %c1_i32 : i32
    %1 = arith.addi %0, %arg1 : i32
    %c0_i32 = arith.constant 0 : i32
    %c0_i32_0 = arith.constant 0 : i32
    %c0_i32_1 = arith.constant 0 : i32
    return %1, %c0_i32, %c0_i32_0 : i32, i32, i32
  }
  func.func @transform_2(%arg0: i32, %arg1: i32) -> (i32, i32, i32) {
    %c0_i32 = arith.constant 0 : i32
    %c0_i32_0 = arith.constant 0 : i32
    %c0_i32_1 = arith.constant 0 : i32
    return %arg0, %c0_i32, %c0_i32_0 : i32, i32, i32
  }
}

</mosaic_0001>

<bundles_post_ra>
// kernel: tpu_custom_call.1
= control target key start
LH: loop header
LB: loop body
LE: loop exit
PB: predicated region body
PF: predicated region fallthrough
CT: control target
= control target key end

     0   :  { %7 = vsyncpa [#allocation4], 0  ;;  %s1017_s0 = inlined_call_operand.hbm [shape: f32[4,4,128], index: 0, kind: input, shape index: {}]   ;;  %s1018_s1 = inlined_call_operand.hbm [shape: s32[4,1,128], index: 1, kind: input, shape index: {}]   ;;  %s1019_s2 = inlined_call_operand.hbm [shape: f32[2,1,128], index: 2, kind: output, shape index: {}]  }
   0x1   :  { %9 = vsyncpa [#allocation4 + $0x1], 0 }
   0x2   :  { %10 = vsyncpa [#allocation7], 0 }
   0x3   :  { %12 = vsyncpa [#allocation7 + $0x1], 0 }
   0x4   :  { %13 = vsyncpa [#allocation5], 0 }
   0x5   :  { %15 = vsyncpa [#allocation5 + $0x1], 0  ;;  %s773_s9 = smov 0   ;;  %s775_s10 = smov 0  }
   0x6   :  { %s777_s11 = smov 0   ;;  %s779_s12 = smov 0  }
   0x7   :  { %s781_s13 = smov 0   ;;  %s783_s14 = smov 0  }
   0x8 LB: > { %s488_s15 = sadd.s32 4294967295, %s747_s14   ;;  %s489_s16 = sadd.s32 4294967294, %s747_s14   ;;  %s747_s14 = sphi %s783_s14, %s21_s14   ;;  %s743_s13 = sphi %s781_s13, %s1037_s13   ;;  %s739_s12 = sphi %s779_s12, %s1036_s12   ;;  %s735_s11 = sphi %s777_s11, %s1035_s11   ;;  %s731_s10 = sphi %s775_s10, %s1034_s10   ;;  %s727_s9 = sphi %s773_s9, %s1033_s9  }
   0x9   : > { %s33_s17 = sadd.s32 1, %s743_s13  ;;  %s42_s18 = sadd.s32 1, %s735_s11 }
   0xa   : > { %p35_p0 = scmp.ge.s32.totalorder %s33_s17, 2  ;;  %p49_p1 = scmp.ne.s32.totalorder %s735_s11, %s731_s10 }
   0xb   : > { %p50_p2 = scmp.eq.s32.totalorder %s747_s14, 0  ;;  %p55_p3 = scmp.ne.s32.totalorder %s731_s10, %s727_s9 }
   0xc   : > { %s1039_s17 = smov (%p35_p0, %s33_s17), 0  ;;  %p56_p5 = scmp.eq.s32.totalorder %s488_s15, 0 }
   0xd   : > { %p814_p4 = por %p50_p2, %p49_p1  ;;  %s39_s20 = ssub.s32 %s743_s13, %s1039_s17 }
   0xe   : > { %p107_p6 = scmp.eq.s32.totalorder %s488_s15, 1  ;;  %p40_p7 = scmp.eq.s32.totalorder %s39_s20, 0 }
   0xf   : > { %p820_p8 = por %p56_p5, %p55_p3  ;;  %p113_p10 = scmp.eq.s32.totalorder %s489_s16, 1 }
  0x10   : > { %p824_p9 = por %p107_p6, %p49_p1  ;;  %p531_p13 = scmp.lt.s32.totalorder %s747_s14, 2 }
  0x11   : > { %s1023_s21 = scalar_select %p820_p8, 1, 0 }
  0x12   : > { %s1024_s22 = scalar_select %p824_p9, 1, 0 }
  0x13   : > { %s829_s23 = scalar_select %p40_p7, %s735_s11, %s42_s18  }
  0x14   : > { %p831_p11 = por %p113_p10, %p55_p3  ;;  %s838_s25 = sand.u32 1, %s735_s11  }
  0x15   : > { %s492_s26 = sshll.u32 %s838_s25, 3  ;;  %s510_s27 = sshll.u32 %s743_s13, 7 }
  0x16   : > { %s1025_s24 = scalar_select %p831_p11, 1, 0 }
  0x17   : > { %s845_s30 = scalar_lea.hbm %s1017_s0, %s510_s27  ;;  %s137_s3 = scalar_lea.vmem [#allocation3], %s492_s26 }
  0x18   : > { %s145_s4 = sshll.u32 %s137_s3, 4  ;;  %p851_p0 = pnand %p531_p13, %p814_p4  ;;  %s847_s4 = int_to_ptr.vmem [resolvable:$true] %s145_s4 }
  0x19   : > { %s134_s6 = scalar_lea.sflag [#allocation4], %s838_s25  ;;  %s601_s7 = scalar_lea.hbm %s845_s30, 128 }
  0x1a   : > { %p602_p2 = scmp.ne.s32.totalorder %s845_s30, %s601_s7  ;;  %p603_p3 = pneg %p851_p0 }
  0x1b   : > { %s606_s16 = scalar_lea.hbm %s1017_s0, 256  ;;  %p607_p4 = scmp.lt.u32.totalorder %s845_s30, %s1017_s0 }
  0x1c   : > { %p604_p5 = pnand %p603_p3, %p602_p2  ;;  %p608_p7 = scmp.lt.u32.totalorder %s606_s16, %s601_s7 }
  0x1d   : > { %p610_p13 = scmp.lt.u32.totalorder %s601_s7, %s845_s30 }
  0x1e   : > { %p605_p6 = pneg %p604_p5  ;;  %p609_p10 = por %p608_p7, %p607_p4 }
  0x20   : > { %p611_p12 = por %p610_p13, %p609_p10 }
  0x22   : > { %p612_p1 = pnand %p611_p12, %p605_p6 }
  0x24   : > { %615 = shalt.err (!%p612_p1)
}
  0x25   : > { %s616_s20 = scalar_lea.vmem %s847_s4, 128  ;;  %s749_s26 = smov [#allocation3]  }
  0x26   : > { %p617_p2 = scmp.ne.s32.totalorder %s847_s4, %s616_s20  ;;  %s621_s27 = sshll.u32 %s749_s26, 4  ;;  %s622_s27 = int_to_ptr.vmem [resolvable:$false] %s621_s27 }
  0x27   : > { %s623_s28 = scalar_lea.vmem %s622_s27, 256  ;;  %p624_p9 = scmp.lt.s32.totalorder %s847_s4, %s622_s27 }
  0x28   : > { %p619_p5 = pnand %p617_p2, %p603_p3  ;;  %p625_p4 = scmp.lt.s32.totalorder %s623_s28, %s616_s20 }
  0x2a   : > { %p620_p11 = pneg %p619_p5  ;;  %p626_p7 = por %p625_p4, %p624_p9 }
  0x2c   : > { %p627_p10 = pnand %p626_p7, %p620_p11 }
  0x2e   : > { %630 = shalt.err (!%p627_p10)
}
  0x2f   : > { %s750_s29 = smov 64   ;;  %s751_s3 = smov 4  }
  0x30   : > { %523 = dma.hbm_to_vmem [thread:$0]  (!%p851_p0), %s845_s30, 128, %s847_s4, %s134_s6, %s750_s29, %s750_s29, %s751_s3  }
  0x31   : > { %p175_p12 = scmp.lt.s32.totalorder %s747_s14, 3  ;;  %s495_s7 = sshll.u32 %s838_s25, 1 }
  0x32   : > { %s511_s8 = sshll.u32 %s743_s13, 5  ;;  %p1027_p9 = scmp.ge.s32.totalorder %s747_s14, 1 }
  0x33   : > { %s896_s19 = scalar_lea.hbm %s1018_s1, %s511_s8  ;;  %s159_s20 = scalar_lea.vmem [#allocation6], %s495_s7 }
  0x34   : > { %p889_p11 = pnand %p1027_p9, %p175_p12  ;;  %s167_s26 = sshll.u32 %s159_s20, 4  ;;  %s898_s26 = int_to_ptr.vmem [resolvable:$true] %s167_s26 }
  0x35   : > { %s156_s30 = scalar_lea.sflag [#allocation7], %s838_s25  ;;  %s631_s4 = scalar_lea.hbm %s896_s19, 32 }
  0x36   : > { %p632_p1 = scmp.ne.s32.totalorder %s896_s19, %s631_s4  ;;  %s636_s28 = scalar_lea.hbm %s1018_s1, 64 }
  0x37   : > { %p637_p2 = scmp.lt.u32.totalorder %s896_s19, %s1018_s1  ;;  %p638_p5 = scmp.lt.u32.totalorder %s636_s28, %s631_s4 }
  0x38   : > { %p634_p6 = pnand %p632_p1, %p603_p3  ;;  %p640_p7 = scmp.lt.u32.totalorder %s631_s4, %s896_s19 }
  0x39   : > { %p639_p4 = por %p638_p5, %p637_p2 }
  0x3a   : > { %p635_p13 = pneg %p634_p6 }
  0x3b   : > { %p641_p10 = por %p640_p7, %p639_p4 }
  0x3d   : > { %p642_p12 = pnand %p641_p10, %p635_p13 }
  0x3f   : > { %645 = shalt.err (!%p642_p12)
}
  0x40   : > { %s646_s7 = scalar_lea.vmem %s898_s26, 32  ;;  %s752_s8 = smov [#allocation6]  }
  0x41   : > { %p647_p9 = scmp.ne.s32.totalorder %s898_s26, %s646_s7  ;;  %s651_s16 = sshll.u32 %s752_s8, 4  ;;  %s652_s16 = int_to_ptr.vmem [resolvable:$false] %s651_s16 }
  0x42   : > { %s653_s18 = scalar_lea.vmem %s652_s16, 64  ;;  %p654_p8 = scmp.lt.s32.totalorder %s898_s26, %s652_s16 }
  0x43   : > { %p649_p1 = pnand %p647_p9, %p603_p3  ;;  %p655_p2 = scmp.lt.s32.totalorder %s653_s18, %s646_s7 }
  0x45   : > { %p650_p6 = pneg %p649_p1  ;;  %p656_p5 = por %p655_p2, %p654_p8 }
  0x47   : > { %p657_p4 = pnand %p656_p5, %p650_p6 }
  0x49   : > { %660 = shalt.err (!%p657_p4)
}
  0x4a   : > { %s753_s20 = smov 16   ;;  %s754_s4 = smov 1  }
  0x4b   : > { %526 = dma.hbm_to_vmem [thread:$0]  (!%p851_p0), %s896_s19, 32, %s898_s26, %s156_s30, %s753_s20, %s753_s20, %s754_s4  }
  0x4c   : > { %179 = sbr.rel (%p889_p11) target bundleno = 670 (0x29e), region = 28  ;;  %s929_s6 = sand.u32 (!%p889_p11), 1, %s731_s10  }
  0x4d   : > { %s499_s27 = sshll.u32 (!%p889_p11), %s929_s6, 3  ;;  %s182_s28 = scalar_lea.sflag (!%p889_p11), [#allocation4], %s929_s6 }
  0x4e   : > { %s185_s29 = scalar_lea.vmem (!%p889_p11), [#allocation3], %s499_s27  ;;  %p1029_p8 = scmp.ne.s32.totalorder (!%p889_p11), %s1023_s21, 0 }
  0x53   : > { %714 = dma.done.wait (%p1029_p8), %s182_s28, 128  }
  0x54   : > { %716 = vsyncadd (%p1029_p8), %s182_s28, 4294967168  ;;  %s500_s25 = sshll.u32 %s929_s6, 1  ;;  %s191_s5 = scalar_lea.sflag [#allocation7], %s929_s6 }
  0x55   : > { %s194_s15 = scalar_lea.vmem [#allocation6], %s500_s25 }
  0x56   : > { %718 = dma.done.wait (%p1029_p8), %s191_s5, 32  }
  0x57   : > { %720 = vsyncadd (%p1029_p8), %s191_s5, 4294967264  ;;  %vm233_vm0 = vcmask 1043456   ;;  %v230_v0 = vld [vmem:[%s185_s29 + $0x4] sm:$0xf]  ;;  %v229_v1 = vld [vmem:[%s185_s29] sm:$0xf]  ;;  %v268_v18 = vlaneseq }
  0x58   : > { %v241_v2 = vsel %vm233_vm0, %v230_v0, -inf  ;;  %v234_v3 = vsel %vm233_vm0, %v229_v1, -inf  ;;  %v502_v22 = vld [vmem:[%s194_s15 + $0x1] ss:$0 sm:$0xff]  ;;  %v501_v23 = vld [vmem:[%s194_s15] ss:$0 sm:$0xff] }
  0x59   : > { %v242_v4 = vrot.slane %v241_v2, 4  ;;  %v235_v5 = vrot.slane %v234_v3, 4  ;;  %v945_v21 = vshrl.u32 %v268_v18, 7  ;;  %v755_v24 = vmov 0.0   ;;  %s505_s21 = sshll.u32 %s739_s12, 1  ;;  %s507_s26 = sshll.u32 %s739_s12, 4 }
  0x5a   : > { %vm344_vm4 = vcmask 1041409   ;;  %vm347_vm5 = vcmask 1024   ;;  %vm227_vm6 = vcmask 0   ;;  %s218_s30 = scalar_lea.vmem [#allocation8], %s929_s6  ;;  %s968_s16 = scalar_lea.hbm %s1019_s2, %s507_s26 }
  0x5b   : > { %v243_v6 = vmax.f32 %v241_v2, %v242_v4  ;;  %v236_v7 = vmax.f32 %v234_v3, %v235_v5  ;;  %vm279_vm1 = vcmp.eq.s32.totalorder %v945_v21, %v502_v22  ;;  %vm278_vm2 = vcmp.eq.s32.totalorder %v945_v21, %v501_v23  ;;  %228 = vst.msk [vmem:[#allocation2] sm:$0x1] %vm227_vm6, %v755_v24  ;;  %s389_s3 = sshll.u32 %s218_s30, 4  ;;  %s377_s18 = scalar_lea.sflag [#allocation5], %s929_s6  ;;  %s970_s3 = int_to_ptr.vmem [resolvable:$true] %s389_s3 }
  0x5c   : > { %v504_v25 = vsel %vm279_vm1, 1.0, %v755_v24  ;;  %v503_v26 = vsel %vm278_vm2, 1.0, %v755_v24  ;;  %v322_v2 = vstv %s505_s21  ;;  %s661_s20 = scalar_lea.vmem %s970_s3, 16  ;;  %p1030_p3 = scmp.ne.s32.totalorder %s1024_s22, 0 }
  0x5d   : > { %v244_v8 = vrot.slane %v243_v6, 2  ;;  %v237_v9 = vrot.slane %v236_v7, 2  ;;  %v323_v5 = vadd.s32 %v322_v2, %v945_v21  ;;  %p662_p0 = scmp.ne.s32.totalorder %s970_s3, %s661_s20  ;;  %s757_s12 = smov [#allocation8]  }
  0x5e   : > { %s665_s4 = sshll.u32 %s757_s12, 4  ;;  %s666_s4 = int_to_ptr.vmem [resolvable:$false] %s665_s4 }
  0x5f   : > { %v245_v10 = vmax.f32 %v243_v6, %v244_v8  ;;  %v238_v11 = vmax.f32 %v236_v7, %v237_v9  ;;  %vm324_vm3 = vcmp.lt.s32.totalorder %v323_v5, 4  ;;  %v335_v7 = vsub.s32 1, %v945_v21  ;;  %p663_p11 = pnand %p662_p0, %p1030_p3  ;;  %s667_s27 = scalar_lea.vmem %s666_s4, 32 }
  0x60   : > { %v506_v8 = vsel %vm324_vm3, 1.0, %v755_v24  ;;  %p668_p7 = scmp.lt.s32.totalorder %s970_s3, %s666_s4  ;;  %p669_p10 = scmp.lt.s32.totalorder %s667_s27, %s661_s20 }
  0x61   : > { %v246_v12 = vrot.slane %v245_v10, 1  ;;  %v239_v13 = vrot.slane %v238_v11, 1  ;;  %p664_p13 = pneg %p663_p11 }
  0x62   : > { %p670_p12 = por %p669_p10, %p668_p7 }
  0x63   : > { %v247_v14 = vmax.f32 %v245_v10, %v246_v12  ;;  %v240_v15 = vmax.f32 %v238_v11, %v239_v13  ;;  %v331_v12 = vsub.s32 0, %v945_v21  ;;  %v336_v13 = vrot.slane %v506_v8, %v335_v7 }
  0x64   : > { %v756_v21 = vmov 0   ;;  %p671_p9 = pnand %p670_p12, %p664_p13 }
  0x65   : > { %v249_v16 = vsub.f32 %v230_v0, %v247_v14  ;;  %v248_v17 = vsub.f32 %v229_v1, %v240_v15  ;;  %587 = vset.pattern.permute.xlu1 %v756_v21  ;;  %588 = vset.pattern.permute.xlu0 %v756_v21 }
  0x67   : > { %v252_v19 = vmul.f32 1.442695, %v249_v16  ;;  %v250_v20 = vmul.f32 1.442695, %v248_v17  ;;  %v332_v17 = vrot.slane %v506_v8, %v331_v12 }
  0x69   : > { %589 = vpow2.f32 %v252_v19 }
  0x6a   : > { %591 = vpow2.f32 %v250_v20 }
  0x73   : > { %v590_v27 = vpop.eup %589 }
  0x74   : > { %v592_v28 = vpop.eup %591  ;;  %v261_v29 = vsel %vm233_vm0, %v590_v27, 0.0  ;;  %v285_v30 = vmul.f32 %v590_v27, %v504_v25 }
  0x75   : > { %v262_v31 = vrot.slane %v261_v29, 4  ;;  %v254_v32 = vsel %vm233_vm0, %v592_v28, 0.0  ;;  %v284_v33 = vmul.f32 %v592_v28, %v503_v26 }
  0x76   : > { %v293_v34 = vsel %vm233_vm0, %v285_v30, 0.0  ;;  %v255_v35 = vrot.slane %v254_v32, 4 }
  0x77   : > { %v263_v36 = vadd.f32 %v262_v31, %v261_v29  ;;  %v294_v37 = vrot.slane %v293_v34, 4  ;;  %v286_v38 = vsel %vm233_vm0, %v284_v33, 0.0 }
  0x78   : > { %v256_v39 = vadd.f32 %v255_v35, %v254_v32  ;;  %v287_v40 = vrot.slane %v286_v38, 4 }
  0x79   : > { %v264_v41 = vrot.slane %v263_v36, 2  ;;  %v295_v42 = vadd.f32 %v294_v37, %v293_v34  ;;  %v327_v34 = vld [vmem:[#allocation2] sm:$0x1] }
  0x7a   : > { %v257_v43 = vrot.slane %v256_v39, 2  ;;  %v288_v44 = vadd.f32 %v287_v40, %v286_v38 }
  0x7b   : > { %v265_v45 = vadd.f32 %v264_v41, %v263_v36  ;;  %v296_v46 = vrot.slane %v295_v42, 2 }
  0x7c   : > { %v258_v47 = vadd.f32 %v257_v43, %v256_v39  ;;  %v289_v50 = vrot.slane %v288_v44, 2 }
  0x7d   : > { %v266_v48 = vrot.slane %v265_v45, 1  ;;  %v297_v52 = vadd.f32 %v296_v46, %v295_v42 }
  0x7e   : > { %v259_v49 = vrot.slane %v258_v47, 1  ;;  %v290_v54 = vadd.f32 %v289_v50, %v288_v44 }
  0x7f   : > { %v267_v51 = vadd.f32 %v266_v48, %v265_v45  ;;  %v298_v55 = vrot.slane %v297_v52, 1 }
  0x80   : > { %v260_v53 = vadd.f32 %v259_v49, %v258_v47  ;;  %v291_v56 = vrot.slane %v290_v54, 1 }
  0x81   : > { %593 = vrcp.f32 %v267_v51  ;;  %v299_v57 = vadd.f32 %v298_v55, %v297_v52 }
  0x82   : > { %595 = vrcp.f32 %v260_v53  ;;  %v292_v58 = vadd.f32 %v291_v56, %v290_v54 }
  0x8b   : > { %v594_v59 = vpop.eup %593 }
  0x8c   : > { %v596_v60 = vpop.eup %595  ;;  %v303_v61 = vmul.f32 %v594_v59, %v299_v57 }
  0x8d   : > { %v301_v62 = vmul.f32 %v596_v60, %v292_v58 }
  0x8e   : > { %306 = vadd.xlane.f32.xlu0 %v303_v61 }
  0x92   : > { %304 = vadd.xlane.f32.xlu0 %v301_v62 }
 0x11b   : > { %v307_v63 = vpop.xlane.xlu0 %306 }
 0x11c   : > { %v309_v0 = vsub.f32 256.0, %v307_v63  ;;  %v311_v9 = vadd.f32 1e-06, %v307_v63 }
 0x11e   : > { %v313_v1 = vadd.f32 1e-06, %v309_v0 }
 0x11f   : > { %v305_v3 = vpop.xlane.xlu0 %304 }
 0x120   : > { %597 = vrcp.f32 %v313_v1  ;;  %v308_v4 = vsub.f32 256.0, %v305_v3  ;;  %v310_v15 = vadd.f32 1e-06, %v305_v3 }
 0x122   : > { %v312_v6 = vadd.f32 1e-06, %v308_v4 }
 0x124   : > { %599 = vrcp.f32 %v312_v6 }
 0x12a   : > { %v598_v10 = vpop.eup %597 }
 0x12b   : > { %v317_v11 = vmul.f32 %v598_v10, %v311_v9 }
 0x12d   : > { %v319_v14 = vsub.f32 1.0, %v317_v11 }
 0x12e   : > { %v600_v16 = vpop.eup %599 }
 0x12f   : > { %v315_v18 = vmul.f32 %v600_v16, %v310_v15  ;;  %v340_v19 = vmul.f32 %v336_v13, %v319_v14 }
 0x131   : > { %v318_v20 = vsub.f32 1.0, %v315_v18  ;;  %v343_v23 = vrot.slane %v340_v19, 7 }
 0x133   : > { %v339_v22 = vmul.f32 %v332_v17, %v318_v20 }
 0x135   : > { %v345_v25 = vsel %vm344_vm4, %v343_v23, %v339_v22 }
 0x136   : > { %v348_v26 = vsel %vm347_vm5, %v345_v25, 0.0 }
 0x137   : > { %349 = vadd.xlane.f32.xlu1 %v348_v26 }
 0x1c4   : > { %v350_v27 = vpop.xlane.xlu1 %349 }
 0x1c5   : > { %v351_v28 = vrot.slane %v350_v27, 4 }
 0x1c7   : > { %v352_v29 = vadd.f32 %v351_v28, %v350_v27 }
 0x1c9   : > { %v353_v30 = vrot.slane %v352_v29, 2 }
 0x1cb   : > { %v354_v31 = vadd.f32 %v353_v30, %v352_v29 }
 0x1cd   : > { %v355_v32 = vrot.slane %v354_v31, 1 }
 0x1cf   : > { %v356_v33 = vadd.f32 %v355_v32, %v354_v31 }
 0x1d1   : > { %512 = vpush %v356_v33 }
 0x202   : > { %s513_s19 = spop %512 }
 0x203   : > { %v358_v35 = vstv %s513_s19 }
 0x204   : > { %v359_v36 = vadd.f32 %v358_v35, %v327_v34 }
 0x206   : > { %361 = vst.msk [vmem:[#allocation2] sm:$0x1] %vm227_vm6, %v359_v36 }
 0x20d   : > { %v365_v24 = vld [vmem:[#allocation2] sm:$0x1] }
 0x20e   : > { %368 = vperm.xlu1 %587, %v365_v24  }
 0x28d   : > { %v369_v37 = vpop.permute.xlu1 %368 }
 0x28e   : > { %v374_v38 = vrot.slane %v369_v37, %v331_v12 }
 0x290   : > { %375 = vst [vmem:[%s218_s30] sm:$0x1] %v374_v38 }
 0x291   : > { %674 = shalt.err (!%p671_p9)
}
 0x292   : > { %s675_s6 = scalar_lea.hbm %s968_s16, 16  ;;  %s679_s25 = scalar_lea.hbm %s1019_s2, 32 }
 0x293   : > { %p676_p1 = scmp.ne.s32.totalorder %s968_s16, %s675_s6  ;;  %p680_p5 = scmp.lt.u32.totalorder %s968_s16, %s1019_s2 }
 0x294   : > { %p681_p4 = scmp.lt.u32.totalorder %s679_s25, %s675_s6  ;;  %p683_p0 = scmp.lt.u32.totalorder %s675_s6, %s968_s16 }
 0x295   : > { %p677_p6 = pnand %p676_p1, %p1030_p3 }
 0x296   : > { %p682_p8 = por %p681_p4, %p680_p5 }
 0x297   : > { %p678_p2 = pneg %p677_p6 }
 0x298   : > { %p684_p11 = por %p683_p0, %p682_p8 }
 0x29a   : > { %p685_p13 = pnand %p684_p11, %p678_p2 }
 0x29c   : > { %688 = shalt.err (!%p685_p13)
}
 0x29d   : > { %518 = dma.vmem_to_hbm [thread:$0]  (%p1030_p3), %s970_s3, 16, %s968_s16, %s377_s18  }
 0x29e PF: > { %s401_s21 = sand.u32 1, %s727_s9   ;;  %p1031_p7 = scmp.ne.s32.totalorder %s1025_s24, 0 }
 0x29f   : > { %p1032_p10 = scmp.ge.s32.totalorder %s747_s14, 2  ;;  %s402_s19 = scalar_lea.sflag [#allocation5], %s401_s21 }
 0x2a1   : > { %p528_p12 = pnand %p1032_p10, %p1031_p7 }
 0x2a3   : > { %722 = dma.done.wait (!%p528_p12), %s402_s19, 16  }
 0x2a4   : > { %724 = vsyncadd (!%p528_p12), %s402_s19, 4294967280  ;;  %s21_s14 = sadd.s32 1, %s747_s14   ;;  %s1033_s9 = smov %s731_s10 }
 0x2a5   : > { %p18_p9 = scmp.ge.s32.totalorder %s21_s14, 4   ;;  %s1034_s10 = smov %s735_s11 }
 0x2a6   : > { %s1035_s11 = smov %s829_s23  ;;  %s1036_s12 = smov %s743_s13 }
 0x2a7   : > { %s1037_s13 = smov %s1039_s17  ;;  %20 = sbr.rel (!%p18_p9) target bundleno = 8 (0x8), region = 94 }
 0x2ae   :  { %406 = vsyncpa [#allocation4], 1 }
 0x2af   :  { %408 = vsyncpa [#allocation4 + $0x1], 1 }
 0x2b0   :  { %409 = vsyncpa [#allocation7], 1 }
 0x2b1   :  { %411 = vsyncpa [#allocation7 + $0x1], 1 }
 0x2b2   :  { %412 = vsyncpa [#allocation5], 1 }
 0x2b3   :  { %414 = vsyncpa [#allocation5 + $0x1], 1 }

</bundles_post_ra>
